<compile_context>
chip_gen: v7x
topology: tpu7x:2x2x1
jax: 0.10.0
libtpu: 0.0.40
codegen_flags: <defaults>
</compile_context>

<pallas_src>
import functools

import numpy as np
import jax
import jax.numpy as jnp
from jax import lax
from jax.experimental import pallas as pl
from jax.experimental.pallas import tpu as pltpu

EPS = 1e-5          # nn.InstanceNorm2d default eps
NEG_SLOPE = 0.01    # nn.LeakyReLU(0.01)


# --------------------------- fused per-block kernel ---------------------------

def _aux_block_kernel(xs_ref, ma_ref, w1_ref, w2_ref, o_ref, patch_ref,
                      *, H, W, Ho, Wo, Hq, Wq):
    """Fused Conv1x1 + IN + LReLU + Conv3x3(s2,p1) + IN + LReLU for one sample.

    xs_ref   : (1, Cin, P)     parity-split zero-padded input, P = 4*Hq*Wq,
                               flat = ((p*2+q)*Hq + a)*Wq + b, padded coords
                               (row, col) = (2a + p, 2b + q).
    ma_ref   : (1, P)          1.0 where (row, col) is inside the original HxW
                               image (not conv padding / parity spare), else 0.
    w1_ref   : (Cmid, Cin)     1x1-conv weight.
    w2_ref   : (Cout, 9*Cmid)  3x3-conv weight, K ordered as (kh, kw, cmid).
    o_ref    : (1, Cout, Lq)   Lq = Ho*Wq; one spare (masked) column per row.
    patch_ref: (9*Cmid, Lq)    VMEM scratch for the single K=9*Cmid matmul.
    """
    Lq = Ho * Wq
    Cmid = w1_ref.shape[0]

    # ---- stage 1: 1x1 conv (one MXU matmul, spatial axis on lanes) ----------
    pre = jnp.dot(w1_ref[...], xs_ref[0],
                  preferred_element_type=jnp.float32)            # (Cmid, P) f32

    # InstanceNorm2d over the H*W valid positions.  With no conv bias the padded
    # positions of `pre` are exactly zero, so plain full-axis sums already give
    # the valid-only statistics (biased variance, as nn.InstanceNorm2d uses).
    cnt1 = float(H * W)
    mean1 = jnp.sum(pre, axis=-1, keepdims=True) / cnt1
    var1 = jnp.maximum(
        jnp.sum(pre * pre, axis=-1, keepdims=True) / cnt1 - mean1 * mean1, 0.0)
    mid = (pre - mean1) * lax.rsqrt(var1 + EPS)
    mid = jnp.where(mid >= 0, mid, NEG_SLOPE * mid)
    # Re-zero the conv-padding ring / parity spares (LeakyReLU(norm(0)) != 0).
    mid = mid * ma_ref[...]

    # ---- stage 2: 3x3 stride-2 conv as ONE matmul with K = 9*Cmid ------------
    for kh in range(3):
        for kw in range(3):
            t = kh * 3 + kw
            plane = (kh % 2) * 2 + (kw % 2)
            s = (plane * Hq + kh // 2) * Wq + (kw // 2)
            patch_ref[t * Cmid:(t + 1) * Cmid, :] = mid[:, s:s + Lq]
    acc = jnp.dot(w2_ref[...], patch_ref[...].astype(w2_ref.dtype),
                  preferred_element_type=jnp.float32)            # (Cout, Lq)

    # InstanceNorm2d over the Ho*Wo valid columns (the one spare column per
    # output row is excluded from the stats and dropped by the wrapper).
    lane = lax.broadcasted_iota(jnp.int32, (1, Lq), 1) % Wq
    vmask = (lane < Wo).astype(jnp.float32)
    cnt2 = float(Ho * Wo)
    mean2 = jnp.sum(acc * vmask, axis=-1, keepdims=True) / cnt2
    var2 = jnp.sum(jnp.square(acc - mean2) * vmask, axis=-1, keepdims=True) / cnt2
    y = (acc - mean2) * lax.rsqrt(var2 + EPS)
    o_ref[0] = jnp.where(y >= 0, y, NEG_SLOPE * y).astype(o_ref.dtype)


def aux_block(x_nchw, w1, w2, *, compute_dtype=jnp.bfloat16):
    """One Auxiliary block, fully fused into a single pallas_call.

    x: (N, Cin, H, W) NCHW f32, w1: (Cmid, Cin), w2: (3, 3, Cmid, Cout) HWIO.
    Returns (N, Cout, Ho, Wo) NCHW f32.  Conv biases are intentionally omitted:
    InstanceNorm2d (affine=False) cancels them exactly.
    """
    N, Cin, H, W = x_nchw.shape
    Cmid = w1.shape[0]
    Cout = w2.shape[-1]
    Ho = (H - 1) // 2 + 1
    Wo = (W - 1) // 2 + 1
    Hq, Wq = Ho + 2, Wo + 1          # parity-plane extents (spare zero row/col)
    P = 4 * Hq * Wq
    Lq = Ho * Wq

    # Single layout pass over x: zero-pad and split into the 4 (row, col) parity
    # planes so every stride-2 tap becomes a contiguous lane slab in the kernel.
    xp = jnp.pad(x_nchw, ((0, 0), (0, 0), (1, 2 * Hq - H - 1), (1, 2 * Wq - W - 1)))
    xs = xp.reshape(N, Cin, Hq, 2, Wq, 2).transpose(0, 1, 3, 5, 2, 4)
    xs = xs.reshape(N, Cin, P).astype(compute_dtype)

    # Static mask of the positions that belong to the original HxW image.
    flat = np.arange(P)
    plane, within = flat // (Hq * Wq), flat % (Hq * Wq)
    row = 2 * (within // Wq) + plane // 2
    col = 2 * (within % Wq) + plane % 2
    mask = ((row >= 1) & (row <= H) & (col >= 1) & (col <= W)).astype(np.float32)
    mask = jnp.asarray(mask.reshape(1, P))

    w1c = w1.astype(compute_dtype)                                      # (Cmid, Cin)
    w2c = jnp.transpose(w2.reshape(9 * Cmid, Cout)).astype(compute_dtype)  # (Cout, 9*Cmid)

    # Explicit VMEM budget from the block footprint (v7x: 64 MiB VMEM total,
    # 32 MiB scoped default; v5e scoped default 16 MiB).
    isz = jnp.dtype(compute_dtype).itemsize
    est = (2 * Cin * P * isz + 2 * Cout * Lq * 4 + P * 4
           + Cmid * Cin * isz + Cout * 9 * Cmid * isz
           + 6 * Cmid * P * 4 + 2 * 9 * Cmid * Lq * 4)
    vmem_limit = int(min(max(4 * est, 16 * 2 ** 20), 64 * 2 ** 20))

    kernel = functools.partial(_aux_block_kernel,
                               H=H, W=W, Ho=Ho, Wo=Wo, Hq=Hq, Wq=Wq)
    y = pl.pallas_call(
        kernel,
        out_shape=jax.ShapeDtypeStruct((N, Cout, Lq), jnp.float32),
        grid=(N,),
        in_specs=[
            pl.BlockSpec((1, Cin, P), lambda n: (n, 0, 0)),
            pl.BlockSpec((1, P), lambda n: (0, 0)),
            pl.BlockSpec((Cmid, Cin), lambda n: (0, 0)),
            pl.BlockSpec((Cout, 9 * Cmid), lambda n: (0, 0)),
        ],
        out_specs=pl.BlockSpec((1, Cout, Lq), lambda n: (n, 0, 0)),
        scratch_shapes=[pltpu.VMEM((9 * Cmid, Lq), jnp.float32)],
        compiler_params=pltpu.CompilerParams(
            dimension_semantics=("parallel",),
            vmem_limit_bytes=vmem_limit),
    )(xs, mask, w1c, w2c)

    # Drop the one spare (masked) column per output row; result is already NCHW.
    return y.reshape(N, Cout, Ho, Wq)[:, :, :, :Wo]


# ------------------------------ Auxiliary model --------------------------------

def init_params(channel, key):
    """One block per i: [Conv1x1(c_i -> c_i//2), IN, LReLU,
                         Conv3x3 s2 p1(c_i//2 -> c_{i+1}), IN, LReLU].
    Biases are kept in the params (PyTorch Conv2d default) but are mathematical
    no-ops under InstanceNorm2d; the kernel does not use them."""
    params = []
    for i in range(len(channel) - 1):
        cin, mid, cout = channel[i], channel[i] // 2, channel[i + 1]
        key, k1, k2, k3, k4 = jax.random.split(key, 5)
        w1 = jax.random.normal(k1, (mid, cin), jnp.float32) / jnp.sqrt(cin)
        b1 = jax.random.normal(k2, (mid,), jnp.float32) * 0.01
        w2 = jax.random.normal(k3, (3, 3, mid, cout), jnp.float32) / jnp.sqrt(9 * mid)
        b2 = jax.random.normal(k4, (cout,), jnp.float32) * 0.01
        params.append((w1, b1, w2, b2))
    return params


def auxiliary_forward(x_nchw, params, compute_dtype=jnp.bfloat16):
    """Returns the list of intermediate feature maps (NCHW), one per block,
    matching Auxiliary.forward (collected after each block's last LeakyReLU)."""
    x = x_nchw
    features = []
    for (w1, _b1, w2, _b2) in params:   # biases cancel under InstanceNorm2d
        x = aux_block(x, w1, w2, compute_dtype=compute_dtype)
        features.append(x)
    return features


# ----------------------------- pure-JAX reference ------------------------------

def _ref_in_lrelu(x):
    mean = jnp.mean(x, axis=(2, 3), keepdims=True)
    var = jnp.mean(jnp.square(x - mean), axis=(2, 3), keepdims=True)
    y = (x - mean) * lax.rsqrt(var + EPS)
    return jnp.where(y >= 0, y, NEG_SLOPE * y)


def reference_forward(x_nchw, params):
    x = x_nchw
    feats = []
    for (w1, b1, w2, b2) in params:
        w1_oihw = w1[:, :, None, None]                        # (Cout, Cin, 1, 1)
        x = lax.conv_general_dilated(
            x, w1_oihw, (1, 1), 'VALID',
            dimension_numbers=('NCHW', 'OIHW', 'NCHW')) + b1[None, :, None, None]
        x = _ref_in_lrelu(x)
        w2_oihw = jnp.transpose(w2, (3, 2, 0, 1))             # HWIO -> OIHW
        x = lax.conv_general_dilated(
            x, w2_oihw, (2, 2), ((1, 1), (1, 1)),
            dimension_numbers=('NCHW', 'OIHW', 'NCHW')) + b2[None, :, None, None]
        x = _ref_in_lrelu(x)
        feats.append(x)
    return feats


# ------------------------------------ main --------------------------------------

if __name__ == "__main__":
    channel = [4, 8, 16]                    # two blocks
    key = jax.random.PRNGKey(0)
    key, kx = jax.random.split(key)
    x = jax.random.normal(kx, (2, 4, 16, 16), jnp.float32)   # NCHW input
    params = init_params(channel, key)

    ref = reference_forward(x, params)
    expected_shapes = [(2, 8, 8, 8), (2, 16, 4, 4)]

    # Bit-accurate check: f32 MXU path.
    fwd_f32 = jax.jit(functools.partial(auxiliary_forward, compute_dtype=jnp.float32))
    feats = [jax.block_until_ready(f) for f in fwd_f32(x, params)]
    for f, r, es in zip(feats, ref, expected_shapes):
        assert f.shape == es, (f.shape, es)
        err = float(jnp.max(jnp.abs(f - r)))
        assert err < 1e-4, err

    # Default perf path: bf16 operands, f32 accumulation.
    fwd_bf16 = jax.jit(auxiliary_forward)
    feats = [jax.block_until_ready(f) for f in fwd_bf16(x, params)]
    for f, r, es in zip(feats, ref, expected_shapes):
        assert f.shape == es, (f.shape, es)
        err = float(jnp.max(jnp.abs(f - r) / (1.0 + jnp.abs(r))))
        assert err < 1e-1, err

    print("KERNEL_OK")
</pallas_src>

<mosaic_0001>
module attributes {stable_mosaic.version = 11 : i64} {
  func.func @_aux_block_kernel(%arg0: i32, %arg1: memref<1x4x360xf32, #tpu.memory_space<vmem>>, %arg2: memref<1x360xf32, #tpu.memory_space<vmem>>, %arg3: memref<2x4xf32, #tpu.memory_space<vmem>>, %arg4: memref<8x18xf32, #tpu.memory_space<vmem>>, %arg5: memref<1x8x72xf32, #tpu.memory_space<vmem>>, %arg6: memref<18x72xf32, #tpu.memory_space<vmem>>) attributes {dimension_semantics = [#tpu.dimension_semantics<parallel>], iteration_bounds = array<i64: 2>, scalar_prefetch = 0 : i64, scratch_operands = 1 : i64, tpu.core_type = #tpu.core_type<tc>, window_params = [{transform_indices = @transform_0, window_bounds = array<i64: 1, 4, 360>}, {pipeline_mode = #tpu.pipeline_mode<synchronous>, transform_indices = @transform_1, window_bounds = array<i64: 1, 360>}, {pipeline_mode = #tpu.pipeline_mode<synchronous>, transform_indices = @transform_2, window_bounds = array<i64: 2, 4>}, {pipeline_mode = #tpu.pipeline_mode<synchronous>, transform_indices = @transform_3, window_bounds = array<i64: 8, 18>}, {transform_indices = @transform_4, window_bounds = array<i64: 1, 8, 72>}]} {
    %c0 = arith.constant 0 : index
    %c0_0 = arith.constant 0 : index
    %0 = vector.load %arg3[%c0, %c0_0] : memref<2x4xf32, #tpu.memory_space<vmem>>, vector<2x4xf32>
    %c0_1 = arith.constant 0 : index
    %c0_2 = arith.constant 0 : index
    %c0_3 = arith.constant 0 : index
    %1 = vector.load %arg1[%c0_1, %c0_2, %c0_3] : memref<1x4x360xf32, #tpu.memory_space<vmem>>, vector<1x4x360xf32>
    %2 = vector.shape_cast %1 : vector<1x4x360xf32> to vector<4x360xf32>
    %cst = arith.constant dense<0.000000e+00> : vector<2x360xf32>
    %3 = tpu.matmul %0, %2, %cst {dimension_numbers = #tpu.dot_dimension_numbers<[1], [0], [0], [1], [0, 0, 1, 1], [], []>} : vector<2x4xf32>, vector<4x360xf32>, vector<2x360xf32> -> vector<2x360xf32>
    %cst_4 = arith.constant dense<0.000000e+00> : vector<2xf32>
    %4 = vector.multi_reduction <add>, %3, %cst_4 [1] : vector<2x360xf32> to vector<2xf32>
    %5 = vector.shape_cast %4 : vector<2xf32> to vector<2x1xf32>
    %cst_5 = arith.constant 2.560000e+02 : f32
    %6 = vector.broadcast %cst_5 : f32 to vector<2x1xf32>
    %7 = arith.divf %5, %6 : vector<2x1xf32>
    %8 = arith.mulf %3, %3 : vector<2x360xf32>
    %cst_6 = arith.constant dense<0.000000e+00> : vector<2xf32>
    %9 = vector.multi_reduction <add>, %8, %cst_6 [1] : vector<2x360xf32> to vector<2xf32>
    %10 = vector.shape_cast %9 : vector<2xf32> to vector<2x1xf32>
    %cst_7 = arith.constant 2.560000e+02 : f32
    %11 = vector.broadcast %cst_7 : f32 to vector<2x1xf32>
    %12 = arith.divf %10, %11 : vector<2x1xf32>
    %13 = arith.mulf %7, %7 : vector<2x1xf32>
    %14 = arith.subf %12, %13 : vector<2x1xf32>
    %cst_8 = arith.constant 0.000000e+00 : f32
    %15 = vector.broadcast %cst_8 : f32 to vector<2x1xf32>
    %16 = arith.maximumf %14, %15 : vector<2x1xf32>
    %17 = vector.broadcast %7 : vector<2x1xf32> to vector<2x360xf32>
    %18 = arith.subf %3, %17 : vector<2x360xf32>
    %cst_9 = arith.constant 9.99999974E-6 : f32
    %19 = vector.broadcast %cst_9 : f32 to vector<2x1xf32>
    %20 = arith.addf %16, %19 : vector<2x1xf32>
    %21 = math.rsqrt %20 : vector<2x1xf32>
    %22 = vector.broadcast %21 : vector<2x1xf32> to vector<2x360xf32>
    %23 = arith.mulf %18, %22 : vector<2x360xf32>
    %cst_10 = arith.constant 0.000000e+00 : f32
    %24 = vector.broadcast %cst_10 : f32 to vector<2x360xf32>
    %25 = arith.cmpf oge, %23, %24 : vector<2x360xf32>
    %cst_11 = arith.constant 0.00999999977 : f32
    %26 = vector.broadcast %cst_11 : f32 to vector<2x360xf32>
    %27 = arith.mulf %26, %23 : vector<2x360xf32>
    %28 = arith.select %25, %23, %27 : vector<2x360xi1>, vector<2x360xf32>
    %c0_12 = arith.constant 0 : index
    %c0_13 = arith.constant 0 : index
    %29 = vector.load %arg2[%c0_12, %c0_13] : memref<1x360xf32, #tpu.memory_space<vmem>>, vector<1x360xf32>
    %30 = vector.broadcast %29 : vector<1x360xf32> to vector<2x360xf32>
    %31 = arith.mulf %28, %30 : vector<2x360xf32>
    %32 = vector.extract_strided_slice %31 {offsets = [0, 0], sizes = [2, 72], strides = [1, 1]} : vector<2x360xf32> to vector<2x72xf32>
    %c0_14 = arith.constant 0 : index
    %c0_15 = arith.constant 0 : index
    %33 = vector.load %arg6[%c0_14, %c0_15] : memref<18x72xf32, #tpu.memory_space<vmem>>, vector<2x72xf32>
    tpu.vector_store %arg6[%c0_14, %c0_15], %32 {strides = array<i32>} : memref<18x72xf32, #tpu.memory_space<vmem>>, vector<2x72xf32>,
    %34 = vector.extract_strided_slice %31 {offsets = [0, 90], sizes = [2, 72], strides = [1, 1]} : vector<2x360xf32> to vector<2x72xf32>
    %c2 = arith.constant 2 : index
    %c0_16 = arith.constant 0 : index
    %35 = vector.load %arg6[%c2, %c0_16] : memref<18x72xf32, #tpu.memory_space<vmem>>, vector<2x72xf32>
    tpu.vector_store %arg6[%c2, %c0_16], %34 {strides = array<i32>} : memref<18x72xf32, #tpu.memory_space<vmem>>, vector<2x72xf32>,
    %36 = vector.extract_strided_slice %31 {offsets = [0, 1], sizes = [2, 72], strides = [1, 1]} : vector<2x360xf32> to vector<2x72xf32>
    %c4 = arith.constant 4 : index
    %c0_17 = arith.constant 0 : index
    %37 = vector.load %arg6[%c4, %c0_17] : memref<18x72xf32, #tpu.memory_space<vmem>>, vector<2x72xf32>
    tpu.vector_store %arg6[%c4, %c0_17], %36 {strides = array<i32>} : memref<18x72xf32, #tpu.memory_space<vmem>>, vector<2x72xf32>,
    %38 = vector.extract_strided_slice %31 {offsets = [0, 180], sizes = [2, 72], strides = [1, 1]} : vector<2x360xf32> to vector<2x72xf32>
    %c6 = arith.constant 6 : index
    %c0_18 = arith.constant 0 : index
    %39 = vector.load %arg6[%c6, %c0_18] : memref<18x72xf32, #tpu.memory_space<vmem>>, vector<2x72xf32>
    tpu.vector_store %arg6[%c6, %c0_18], %38 {strides = array<i32>} : memref<18x72xf32, #tpu.memory_space<vmem>>, vector<2x72xf32>,
    %40 = vector.extract_strided_slice %31 {offsets = [0, 270], sizes = [2, 72], strides = [1, 1]} : vector<2x360xf32> to vector<2x72xf32>
    %c8 = arith.constant 8 : index
    %c0_19 = arith.constant 0 : index
    %41 = vector.load %arg6[%c8, %c0_19] : memref<18x72xf32, #tpu.memory_space<vmem>>, vector<2x72xf32>
    tpu.vector_store %arg6[%c8, %c0_19], %40 {strides = array<i32>} : memref<18x72xf32, #tpu.memory_space<vmem>>, vector<2x72xf32>,
    %42 = vector.extract_strided_slice %31 {offsets = [0, 181], sizes = [2, 72], strides = [1, 1]} : vector<2x360xf32> to vector<2x72xf32>
    %c10 = arith.constant 10 : index
    %c0_20 = arith.constant 0 : index
    %43 = vector.load %arg6[%c10, %c0_20] : memref<18x72xf32, #tpu.memory_space<vmem>>, vector<2x72xf32>
    tpu.vector_store %arg6[%c10, %c0_20], %42 {strides = array<i32>} : memref<18x72xf32, #tpu.memory_space<vmem>>, vector<2x72xf32>,
    %44 = vector.extract_strided_slice %31 {offsets = [0, 9], sizes = [2, 72], strides = [1, 1]} : vector<2x360xf32> to vector<2x72xf32>
    %c12 = arith.constant 12 : index
    %c0_21 = arith.constant 0 : index
    %45 = vector.load %arg6[%c12, %c0_21] : memref<18x72xf32, #tpu.memory_space<vmem>>, vector<2x72xf32>
    tpu.vector_store %arg6[%c12, %c0_21], %44 {strides = array<i32>} : memref<18x72xf32, #tpu.memory_space<vmem>>, vector<2x72xf32>,
    %46 = vector.extract_strided_slice %31 {offsets = [0, 99], sizes = [2, 72], strides = [1, 1]} : vector<2x360xf32> to vector<2x72xf32>
    %c14 = arith.constant 14 : index
    %c0_22 = arith.constant 0 : index
    %47 = vector.load %arg6[%c14, %c0_22] : memref<18x72xf32, #tpu.memory_space<vmem>>, vector<2x72xf32>
    tpu.vector_store %arg6[%c14, %c0_22], %46 {strides = array<i32>} : memref<18x72xf32, #tpu.memory_space<vmem>>, vector<2x72xf32>,
    %48 = vector.extract_strided_slice %31 {offsets = [0, 10], sizes = [2, 72], strides = [1, 1]} : vector<2x360xf32> to vector<2x72xf32>
    %c16 = arith.constant 16 : index
    %c0_23 = arith.constant 0 : index
    %49 = vector.load %arg6[%c16, %c0_23] : memref<18x72xf32, #tpu.memory_space<vmem>>, vector<2x72xf32>
    tpu.vector_store %arg6[%c16, %c0_23], %48 {strides = array<i32>} : memref<18x72xf32, #tpu.memory_space<vmem>>, vector<2x72xf32>,
    %c0_24 = arith.constant 0 : index
    %c0_25 = arith.constant 0 : index
    %50 = vector.load %arg4[%c0_24, %c0_25] : memref<8x18xf32, #tpu.memory_space<vmem>>, vector<8x18xf32>
    %c0_26 = arith.constant 0 : index
    %c0_27 = arith.constant 0 : index
    %51 = vector.load %arg6[%c0_26, %c0_27] : memref<18x72xf32, #tpu.memory_space<vmem>>, vector<18x72xf32>
    %cst_28 = arith.constant dense<0.000000e+00> : vector<8x72xf32>
    %52 = tpu.matmul %50, %51, %cst_28 {dimension_numbers = #tpu.dot_dimension_numbers<[1], [0], [0], [1], [0, 0, 1, 1], [], []>} : vector<8x18xf32>, vector<18x72xf32>, vector<8x72xf32> -> vector<8x72xf32>
    %53 = tpu.iota {dimensions = array<i32: 1>} : vector<1x72xi32>
    %c9_i32 = arith.constant 9 : i32
    %c0_i32 = arith.constant 0 : i32
    %54 = arith.cmpi eq, %c9_i32, %c0_i32 : i32
    %c1_i32 = arith.constant 1 : i32
    %55 = arith.select %54, %c1_i32, %c9_i32 : i32
    %56 = vector.broadcast %55 : i32 to vector<1x72xi32>
    %57 = arith.remsi %53, %56 : vector<1x72xi32>
    %c0_i32_29 = arith.constant 0 : i32
    %58 = vector.broadcast %c0_i32_29 : i32 to vector<1x72xi32>
    %59 = arith.cmpi ne, %57, %58 : vector<1x72xi32>
    %c0_i32_30 = arith.constant 0 : i32
    %60 = vector.broadcast %c0_i32_30 : i32 to vector<1x72xi32>
    %61 = arith.cmpi slt, %57, %60 : vector<1x72xi32>
    %c0_i32_31 = arith.constant 0 : i32
    %62 = arith.cmpi slt, %55, %c0_i32_31 : i32
    %63 = vector.broadcast %62 : i1 to vector<1x72xi1>
    %64 = vector.broadcast %63 : vector<1x72xi1> to vector<1x72xi1>
    %65 = arith.xori %61, %64 : vector<1x72xi1>
    %66 = arith.andi %65, %59 : vector<1x72xi1>
    %67 = vector.broadcast %55 : i32 to vector<1x72xi32>
    %68 = arith.addi %57, %67 : vector<1x72xi32>
    %69 = arith.select %66, %68, %57 : vector<1x72xi1>, vector<1x72xi32>
    %c8_i32 = arith.constant 8 : i32
    %70 = vector.broadcast %c8_i32 : i32 to vector<1x72xi32>
    %71 = arith.cmpi slt, %69, %70 : vector<1x72xi32>
    %72 = arith.extui %71 : vector<1x72xi1> to vector<1x72xi32>
    %73 = arith.sitofp %72 : vector<1x72xi32> to vector<1x72xf32>
    %74 = vector.broadcast %73 : vector<1x72xf32> to vector<8x72xf32>
    %75 = arith.mulf %52, %74 : vector<8x72xf32>
    %cst_32 = arith.constant dense<0.000000e+00> : vector<8xf32>
    %76 = vector.multi_reduction <add>, %75, %cst_32 [1] : vector<8x72xf32> to vector<8xf32>
    %77 = vector.shape_cast %76 : vector<8xf32> to vector<8x1xf32>
    %cst_33 = arith.constant 6.400000e+01 : f32
    %78 = vector.broadcast %cst_33 : f32 to vector<8x1xf32>
    %79 = arith.divf %77, %78 : vector<8x1xf32>
    %80 = vector.broadcast %79 : vector<8x1xf32> to vector<8x72xf32>
    %81 = arith.subf %52, %80 : vector<8x72xf32>
    %82 = arith.mulf %81, %81 : vector<8x72xf32>
    %83 = vector.broadcast %73 : vector<1x72xf32> to vector<8x72xf32>
    %84 = arith.mulf %82, %83 : vector<8x72xf32>
    %cst_34 = arith.constant dense<0.000000e+00> : vector<8xf32>
    %85 = vector.multi_reduction <add>, %84, %cst_34 [1] : vector<8x72xf32> to vector<8xf32>
    %86 = vector.shape_cast %85 : vector<8xf32> to vector<8x1xf32>
    %cst_35 = arith.constant 6.400000e+01 : f32
    %87 = vector.broadcast %cst_35 : f32 to vector<8x1xf32>
    %88 = arith.divf %86, %87 : vector<8x1xf32>
    %89 = vector.broadcast %79 : vector<8x1xf32> to vector<8x72xf32>
    %90 = arith.subf %52, %89 : vector<8x72xf32>
    %cst_36 = arith.constant 9.99999974E-6 : f32
    %91 = vector.broadcast %cst_36 : f32 to vector<8x1xf32>
    %92 = arith.addf %88, %91 : vector<8x1xf32>
    %93 = math.rsqrt %92 : vector<8x1xf32>
    %94 = vector.broadcast %93 : vector<8x1xf32> to vector<8x72xf32>
    %95 = arith.mulf %90, %94 : vector<8x72xf32>
    %cst_37 = arith.constant 0.000000e+00 : f32
    %96 = vector.broadcast %cst_37 : f32 to vector<8x72xf32>
    %97 = arith.cmpf oge, %95, %96 : vector<8x72xf32>
    %cst_38 = arith.constant 0.00999999977 : f32
    %98 = vector.broadcast %cst_38 : f32 to vector<8x72xf32>
    %99 = arith.mulf %98, %95 : vector<8x72xf32>
    %100 = arith.select %97, %95, %99 : vector<8x72xi1>, vector<8x72xf32>
    %c0_39 = arith.constant 0 : index
    %c0_40 = arith.constant 0 : index
    %c0_41 = arith.constant 0 : index
    %101 = vector.load %arg5[%c0_39, %c0_40, %c0_41] : memref<1x8x72xf32, #tpu.memory_space<vmem>>, vector<1x8x72xf32>
    %102 = vector.shape_cast %101 : vector<1x8x72xf32> to vector<8x72xf32>
    %103 = vector.shape_cast %100 : vector<8x72xf32> to vector<1x8x72xf32>
    tpu.vector_store %arg5[%c0_39, %c0_40, %c0_41], %103 {strides = array<i32>} : memref<1x8x72xf32, #tpu.memory_space<vmem>>, vector<1x8x72xf32>,
    return
  }
  func.func @transform_0(%arg0: i32) -> (i32, i32, i32) {
    %c0_i32 = arith.constant 0 : i32
    %c0_i32_0 = arith.constant 0 : i32
    %c0_i32_1 = arith.constant 0 : i32
    return %arg0, %c0_i32, %c0_i32_0 : i32, i32, i32
  }
  func.func @transform_1(%arg0: i32) -> (i32, i32) {
    %c0_i32 = arith.constant 0 : i32
    %c0_i32_0 = arith.constant 0 : i32
    %c0_i32_1 = arith.constant 0 : i32
    return %c0_i32, %c0_i32_0 : i32, i32
  }
  func.func @transform_2(%arg0: i32) -> (i32, i32) {
    %c0_i32 = arith.constant 0 : i32
    %c0_i32_0 = arith.constant 0 : i32
    %c0_i32_1 = arith.constant 0 : i32
    return %c0_i32, %c0_i32_0 : i32, i32
  }
  func.func @transform_3(%arg0: i32) -> (i32, i32) {
    %c0_i32 = arith.constant 0 : i32
    %c0_i32_0 = arith.constant 0 : i32
    %c0_i32_1 = arith.constant 0 : i32
    return %c0_i32, %c0_i32_0 : i32, i32
  }
  func.func @transform_4(%arg0: i32) -> (i32, i32, i32) {
    %c0_i32 = arith.constant 0 : i32
    %c0_i32_0 = arith.constant 0 : i32
    %c0_i32_1 = arith.constant 0 : i32
    return %arg0, %c0_i32, %c0_i32_0 : i32, i32, i32
  }
}

module attributes {stable_mosaic.version = 11 : i64} {
  func.func @_aux_block_kernel(%arg0: i32, %arg1: memref<1x8x120xf32, #tpu.memory_space<vmem>>, %arg2: memref<1x120xf32, #tpu.memory_space<vmem>>, %arg3: memref<4x8xf32, #tpu.memory_space<vmem>>, %arg4: memref<16x36xf32, #tpu.memory_space<vmem>>, %arg5: memref<1x16x20xf32, #tpu.memory_space<vmem>>, %arg6: memref<36x20xf32, #tpu.memory_space<vmem>>) attributes {dimension_semantics = [#tpu.dimension_semantics<parallel>], iteration_bounds = array<i64: 2>, scalar_prefetch = 0 : i64, scratch_operands = 1 : i64, tpu.core_type = #tpu.core_type<tc>, window_params = [{transform_indices = @transform_0, window_bounds = array<i64: 1, 8, 120>}, {pipeline_mode = #tpu.pipeline_mode<synchronous>, transform_indices = @transform_1, window_bounds = array<i64: 1, 120>}, {pipeline_mode = #tpu.pipeline_mode<synchronous>, transform_indices = @transform_2, window_bounds = array<i64: 4, 8>}, {pipeline_mode = #tpu.pipeline_mode<synchronous>, transform_indices = @transform_3, window_bounds = array<i64: 16, 36>}, {transform_indices = @transform_4, window_bounds = array<i64: 1, 16, 20>}]} {
    %c0 = arith.constant 0 : index
    %c0_0 = arith.constant 0 : index
    %0 = vector.load %arg3[%c0, %c0_0] : memref<4x8xf32, #tpu.memory_space<vmem>>, vector<4x8xf32>
    %c0_1 = arith.constant 0 : index
    %c0_2 = arith.constant 0 : index
    %c0_3 = arith.constant 0 : index
    %1 = vector.load %arg1[%c0_1, %c0_2, %c0_3] : memref<1x8x120xf32, #tpu.memory_space<vmem>>, vector<1x8x120xf32>
    %2 = vector.shape_cast %1 : vector<1x8x120xf32> to vector<8x120xf32>
    %cst = arith.constant dense<0.000000e+00> : vector<4x120xf32>
    %3 = tpu.matmul %0, %2, %cst {dimension_numbers = #tpu.dot_dimension_numbers<[1], [0], [0], [1], [0, 0, 1, 1], [], []>} : vector<4x8xf32>, vector<8x120xf32>, vector<4x120xf32> -> vector<4x120xf32>
    %cst_4 = arith.constant dense<0.000000e+00> : vector<4xf32>
    %4 = vector.multi_reduction <add>, %3, %cst_4 [1] : vector<4x120xf32> to vector<4xf32>
    %5 = vector.shape_cast %4 : vector<4xf32> to vector<4x1xf32>
    %cst_5 = arith.constant 6.400000e+01 : f32
    %6 = vector.broadcast %cst_5 : f32 to vector<4x1xf32>
    %7 = arith.divf %5, %6 : vector<4x1xf32>
    %8 = arith.mulf %3, %3 : vector<4x120xf32>
    %cst_6 = arith.constant dense<0.000000e+00> : vector<4xf32>
    %9 = vector.multi_reduction <add>, %8, %cst_6 [1] : vector<4x120xf32> to vector<4xf32>
    %10 = vector.shape_cast %9 : vector<4xf32> to vector<4x1xf32>
    %cst_7 = arith.constant 6.400000e+01 : f32
    %11 = vector.broadcast %cst_7 : f32 to vector<4x1xf32>
    %12 = arith.divf %10, %11 : vector<4x1xf32>
    %13 = arith.mulf %7, %7 : vector<4x1xf32>
    %14 = arith.subf %12, %13 : vector<4x1xf32>
    %cst_8 = arith.constant 0.000000e+00 : f32
    %15 = vector.broadcast %cst_8 : f32 to vector<4x1xf32>
    %16 = arith.maximumf %14, %15 : vector<4x1xf32>
    %17 = vector.broadcast %7 : vector<4x1xf32> to vector<4x120xf32>
    %18 = arith.subf %3, %17 : vector<4x120xf32>
    %cst_9 = arith.constant 9.99999974E-6 : f32
    %19 = vector.broadcast %cst_9 : f32 to vector<4x1xf32>
    %20 = arith.addf %16, %19 : vector<4x1xf32>
    %21 = math.rsqrt %20 : vector<4x1xf32>
    %22 = vector.broadcast %21 : vector<4x1xf32> to vector<4x120xf32>
    %23 = arith.mulf %18, %22 : vector<4x120xf32>
    %cst_10 = arith.constant 0.000000e+00 : f32
    %24 = vector.broadcast %cst_10 : f32 to vector<4x120xf32>
    %25 = arith.cmpf oge, %23, %24 : vector<4x120xf32>
    %cst_11 = arith.constant 0.00999999977 : f32
    %26 = vector.broadcast %cst_11 : f32 to vector<4x120xf32>
    %27 = arith.mulf %26, %23 : vector<4x120xf32>
    %28 = arith.select %25, %23, %27 : vector<4x120xi1>, vector<4x120xf32>
    %c0_12 = arith.constant 0 : index
    %c0_13 = arith.constant 0 : index
    %29 = vector.load %arg2[%c0_12, %c0_13] : memref<1x120xf32, #tpu.memory_space<vmem>>, vector<1x120xf32>
    %30 = vector.broadcast %29 : vector<1x120xf32> to vector<4x120xf32>
    %31 = arith.mulf %28, %30 : vector<4x120xf32>
    %32 = vector.extract_strided_slice %31 {offsets = [0, 0], sizes = [4, 20], strides = [1, 1]} : vector<4x120xf32> to vector<4x20xf32>
    %c0_14 = arith.constant 0 : index
    %c0_15 = arith.constant 0 : index
    %33 = vector.load %arg6[%c0_14, %c0_15] : memref<36x20xf32, #tpu.memory_space<vmem>>, vector<4x20xf32>
    tpu.vector_store %arg6[%c0_14, %c0_15], %32 {strides = array<i32>} : memref<36x20xf32, #tpu.memory_space<vmem>>, vector<4x20xf32>,
    %34 = vector.extract_strided_slice %31 {offsets = [0, 30], sizes = [4, 20], strides = [1, 1]} : vector<4x120xf32> to vector<4x20xf32>
    %c4 = arith.constant 4 : index
    %c0_16 = arith.constant 0 : index
    %35 = vector.load %arg6[%c4, %c0_16] : memref<36x20xf32, #tpu.memory_space<vmem>>, vector<4x20xf32>
    tpu.vector_store %arg6[%c4, %c0_16], %34 {strides = array<i32>} : memref<36x20xf32, #tpu.memory_space<vmem>>, vector<4x20xf32>,
    %36 = vector.extract_strided_slice %31 {offsets = [0, 1], sizes = [4, 20], strides = [1, 1]} : vector<4x120xf32> to vector<4x20xf32>
    %c8 = arith.constant 8 : index
    %c0_17 = arith.constant 0 : index
    %37 = vector.load %arg6[%c8, %c0_17] : memref<36x20xf32, #tpu.memory_space<vmem>>, vector<4x20xf32>
    tpu.vector_store %arg6[%c8, %c0_17], %36 {strides = array<i32>} : memref<36x20xf32, #tpu.memory_space<vmem>>, vector<4x20xf32>,
    %38 = vector.extract_strided_slice %31 {offsets = [0, 60], sizes = [4, 20], strides = [1, 1]} : vector<4x120xf32> to vector<4x20xf32>
    %c12 = arith.constant 12 : index
    %c0_18 = arith.constant 0 : index
    %39 = vector.load %arg6[%c12, %c0_18] : memref<36x20xf32, #tpu.memory_space<vmem>>, vector<4x20xf32>
    tpu.vector_store %arg6[%c12, %c0_18], %38 {strides = array<i32>} : memref<36x20xf32, #tpu.memory_space<vmem>>, vector<4x20xf32>,
    %40 = vector.extract_strided_slice %31 {offsets = [0, 90], sizes = [4, 20], strides = [1, 1]} : vector<4x120xf32> to vector<4x20xf32>
    %c16 = arith.constant 16 : index
    %c0_19 = arith.constant 0 : index
    %41 = vector.load %arg6[%c16, %c0_19] : memref<36x20xf32, #tpu.memory_space<vmem>>, vector<4x20xf32>
    tpu.vector_store %arg6[%c16, %c0_19], %40 {strides = array<i32>} : memref<36x20xf32, #tpu.memory_space<vmem>>, vector<4x20xf32>,
    %42 = vector.extract_strided_slice %31 {offsets = [0, 61], sizes = [4, 20], strides = [1, 1]} : vector<4x120xf32> to vector<4x20xf32>
    %c20 = arith.constant 20 : index
    %c0_20 = arith.constant 0 : index
    %43 = vector.load %arg6[%c20, %c0_20] : memref<36x20xf32, #tpu.memory_space<vmem>>, vector<4x20xf32>
    tpu.vector_store %arg6[%c20, %c0_20], %42 {strides = array<i32>} : memref<36x20xf32, #tpu.memory_space<vmem>>, vector<4x20xf32>,
    %44 = vector.extract_strided_slice %31 {offsets = [0, 5], sizes = [4, 20], strides = [1, 1]} : vector<4x120xf32> to vector<4x20xf32>
    %c24 = arith.constant 24 : index
    %c0_21 = arith.constant 0 : index
    %45 = vector.load %arg6[%c24, %c0_21] : memref<36x20xf32, #tpu.memory_space<vmem>>, vector<4x20xf32>
    tpu.vector_store %arg6[%c24, %c0_21], %44 {strides = array<i32>} : memref<36x20xf32, #tpu.memory_space<vmem>>, vector<4x20xf32>,
    %46 = vector.extract_strided_slice %31 {offsets = [0, 35], sizes = [4, 20], strides = [1, 1]} : vector<4x120xf32> to vector<4x20xf32>
    %c28 = arith.constant 28 : index
    %c0_22 = arith.constant 0 : index
    %47 = vector.load %arg6[%c28, %c0_22] : memref<36x20xf32, #tpu.memory_space<vmem>>, vector<4x20xf32>
    tpu.vector_store %arg6[%c28, %c0_22], %46 {strides = array<i32>} : memref<36x20xf32, #tpu.memory_space<vmem>>, vector<4x20xf32>,
    %48 = vector.extract_strided_slice %31 {offsets = [0, 6], sizes = [4, 20], strides = [1, 1]} : vector<4x120xf32> to vector<4x20xf32>
    %c32 = arith.constant 32 : index
    %c0_23 = arith.constant 0 : index
    %49 = vector.load %arg6[%c32, %c0_23] : memref<36x20xf32, #tpu.memory_space<vmem>>, vector<4x20xf32>
    tpu.vector_store %arg6[%c32, %c0_23], %48 {strides = array<i32>} : memref<36x20xf32, #tpu.memory_space<vmem>>, vector<4x20xf32>,
    %c0_24 = arith.constant 0 : index
    %c0_25 = arith.constant 0 : index
    %50 = vector.load %arg4[%c0_24, %c0_25] : memref<16x36xf32, #tpu.memory_space<vmem>>, vector<16x36xf32>
    %c0_26 = arith.constant 0 : index
    %c0_27 = arith.constant 0 : index
    %51 = vector.load %arg6[%c0_26, %c0_27] : memref<36x20xf32, #tpu.memory_space<vmem>>, vector<36x20xf32>
    %cst_28 = arith.constant dense<0.000000e+00> : vector<16x20xf32>
    %52 = tpu.matmul %50, %51, %cst_28 {dimension_numbers = #tpu.dot_dimension_numbers<[1], [0], [0], [1], [0, 0, 1, 1], [], []>} : vector<16x36xf32>, vector<36x20xf32>, vector<16x20xf32> -> vector<16x20xf32>
    %53 = tpu.iota {dimensions = array<i32: 1>} : vector<1x20xi32>
    %c5_i32 = arith.constant 5 : i32
    %c0_i32 = arith.constant 0 : i32
    %54 = arith.cmpi eq, %c5_i32, %c0_i32 : i32
    %c1_i32 = arith.constant 1 : i32
    %55 = arith.select %54, %c1_i32, %c5_i32 : i32
    %56 = vector.broadcast %55 : i32 to vector<1x20xi32>
    %57 = arith.remsi %53, %56 : vector<1x20xi32>
    %c0_i32_29 = arith.constant 0 : i32
    %58 = vector.broadcast %c0_i32_29 : i32 to vector<1x20xi32>
    %59 = arith.cmpi ne, %57, %58 : vector<1x20xi32>
    %c0_i32_30 = arith.constant 0 : i32
    %60 = vector.broadcast %c0_i32_30 : i32 to vector<1x20xi32>
    %61 = arith.cmpi slt, %57, %60 : vector<1x20xi32>
    %c0_i32_31 = arith.constant 0 : i32
    %62 = arith.cmpi slt, %55, %c0_i32_31 : i32
    %63 = vector.broadcast %62 : i1 to vector<1x20xi1>
    %64 = vector.broadcast %63 : vector<1x20xi1> to vector<1x20xi1>
    %65 = arith.xori %61, %64 : vector<1x20xi1>
    %66 = arith.andi %65, %59 : vector<1x20xi1>
    %67 = vector.broadcast %55 : i32 to vector<1x20xi32>
    %68 = arith.addi %57, %67 : vector<1x20xi32>
    %69 = arith.select %66, %68, %57 : vector<1x20xi1>, vector<1x20xi32>
    %c4_i32 = arith.constant 4 : i32
    %70 = vector.broadcast %c4_i32 : i32 to vector<1x20xi32>
    %71 = arith.cmpi slt, %69, %70 : vector<1x20xi32>
    %72 = arith.extui %71 : vector<1x20xi1> to vector<1x20xi32>
    %73 = arith.sitofp %72 : vector<1x20xi32> to vector<1x20xf32>
    %74 = vector.broadcast %73 : vector<1x20xf32> to vector<16x20xf32>
    %75 = arith.mulf %52, %74 : vector<16x20xf32>
    %cst_32 = arith.constant dense<0.000000e+00> : vector<16xf32>
    %76 = vector.multi_reduction <add>, %75, %cst_32 [1] : vector<16x20xf32> to vector<16xf32>
    %77 = vector.shape_cast %76 : vector<16xf32> to vector<16x1xf32>
    %cst_33 = arith.constant 1.600000e+01 : f32
    %78 = vector.broadcast %cst_33 : f32 to vector<16x1xf32>
    %79 = arith.divf %77, %78 : vector<16x1xf32>
    %80 = vector.broadcast %79 : vector<16x1xf32> to vector<16x20xf32>
    %81 = arith.subf %52, %80 : vector<16x20xf32>
    %82 = arith.mulf %81, %81 : vector<16x20xf32>
    %83 = vector.broadcast %73 : vector<1x20xf32> to vector<16x20xf32>
    %84 = arith.mulf %82, %83 : vector<16x20xf32>
    %cst_34 = arith.constant dense<0.000000e+00> : vector<16xf32>
    %85 = vector.multi_reduction <add>, %84, %cst_34 [1] : vector<16x20xf32> to vector<16xf32>
    %86 = vector.shape_cast %85 : vector<16xf32> to vector<16x1xf32>
    %cst_35 = arith.constant 1.600000e+01 : f32
    %87 = vector.broadcast %cst_35 : f32 to vector<16x1xf32>
    %88 = arith.divf %86, %87 : vector<16x1xf32>
    %89 = vector.broadcast %79 : vector<16x1xf32> to vector<16x20xf32>
    %90 = arith.subf %52, %89 : vector<16x20xf32>
    %cst_36 = arith.constant 9.99999974E-6 : f32
    %91 = vector.broadcast %cst_36 : f32 to vector<16x1xf32>
    %92 = arith.addf %88, %91 : vector<16x1xf32>
    %93 = math.rsqrt %92 : vector<16x1xf32>
    %94 = vector.broadcast %93 : vector<16x1xf32> to vector<16x20xf32>
    %95 = arith.mulf %90, %94 : vector<16x20xf32>
    %cst_37 = arith.constant 0.000000e+00 : f32
    %96 = vector.broadcast %cst_37 : f32 to vector<16x20xf32>
    %97 = arith.cmpf oge, %95, %96 : vector<16x20xf32>
    %cst_38 = arith.constant 0.00999999977 : f32
    %98 = vector.broadcast %cst_38 : f32 to vector<16x20xf32>
    %99 = arith.mulf %98, %95 : vector<16x20xf32>
    %100 = arith.select %97, %95, %99 : vector<16x20xi1>, vector<16x20xf32>
    %c0_39 = arith.constant 0 : index
    %c0_40 = arith.constant 0 : index
    %c0_41 = arith.constant 0 : index
    %101 = vector.load %arg5[%c0_39, %c0_40, %c0_41] : memref<1x16x20xf32, #tpu.memory_space<vmem>>, vector<1x16x20xf32>
    %102 = vector.shape_cast %101 : vector<1x16x20xf32> to vector<16x20xf32>
    %103 = vector.shape_cast %100 : vector<16x20xf32> to vector<1x16x20xf32>
    tpu.vector_store %arg5[%c0_39, %c0_40, %c0_41], %103 {strides = array<i32>} : memref<1x16x20xf32, #tpu.memory_space<vmem>>, vector<1x16x20xf32>,
    return
  }
  func.func @transform_0(%arg0: i32) -> (i32, i32, i32) {
    %c0_i32 = arith.constant 0 : i32
    %c0_i32_0 = arith.constant 0 : i32
    %c0_i32_1 = arith.constant 0 : i32
    return %arg0, %c0_i32, %c0_i32_0 : i32, i32, i32
  }
  func.func @transform_1(%arg0: i32) -> (i32, i32) {
    %c0_i32 = arith.constant 0 : i32
    %c0_i32_0 = arith.constant 0 : i32
    %c0_i32_1 = arith.constant 0 : i32
    return %c0_i32, %c0_i32_0 : i32, i32
  }
  func.func @transform_2(%arg0: i32) -> (i32, i32) {
    %c0_i32 = arith.constant 0 : i32
    %c0_i32_0 = arith.constant 0 : i32
    %c0_i32_1 = arith.constant 0 : i32
    return %c0_i32, %c0_i32_0 : i32, i32
  }
  func.func @transform_3(%arg0: i32) -> (i32, i32) {
    %c0_i32 = arith.constant 0 : i32
    %c0_i32_0 = arith.constant 0 : i32
    %c0_i32_1 = arith.constant 0 : i32
    return %c0_i32, %c0_i32_0 : i32, i32
  }
  func.func @transform_4(%arg0: i32) -> (i32, i32, i32) {
    %c0_i32 = arith.constant 0 : i32
    %c0_i32_0 = arith.constant 0 : i32
    %c0_i32_1 = arith.constant 0 : i32
    return %arg0, %c0_i32, %c0_i32_0 : i32, i32, i32
  }
}

</mosaic_0001>

<bundles_post_ra>
// kernel: auxiliary_forward.2
= control target key start
LH: loop header
LB: loop body
LE: loop exit
PB: predicated region body
PF: predicated region fallthrough
CT: control target
= control target key end

     0   :  { %s748_s15 = smov 0   ;;  %s807_s0 = inlined_call_operand.vmem [shape: f32[2,4,360], index: 0, kind: input, shape index: {}]   ;;  %s808_s1 = inlined_call_operand.vmem [shape: f32[1,360], index: 1, kind: input, shape index: {}]   ;;  %s809_s2 = inlined_call_operand.vmem [shape: f32[2,4], index: 2, kind: input, shape index: {}]   ;;  %s810_s3 = inlined_call_operand.vmem [shape: f32[8,18], index: 3, kind: input, shape index: {}]   ;;  %s811_s4 = inlined_call_operand.vmem [shape: f32[2,8,72], index: 4, kind: output, shape index: {}]  }
   0x1 LB: > { %s637_s16 = sadd.s32 4294967295, %s710_s15   ;;  %p641_p0 = scmp.ge.s32.totalorder %s710_s15, 1  ;;  %s710_s15 = sphi %s748_s15, %s14_s15  }
   0x2   : > { %p162_p1 = scmp.lt.s32.totalorder %s710_s15, 3 }
   0x4   : > { %p163_p2 = pnand %p641_p0, %p162_p1 }
   0x5   : > { %p187_p3 = scmp.lt.s32.totalorder (!%p163_p2), %s637_s16, 1  ;;  %v712_v0 = vmov (!%p163_p2), 0.0   ;;  %vm713_vm0 = vmmov (!%p163_p2), 0   ;;  %vm206_vm1 = vcmask (!%p163_p2), 1043456   ;;  %v196_v3 = vld [vmem:[%s809_s2] sm:$0x3] (!%p163_p2)  ;;  %v398_v30 = vlaneseq (!%p163_p2) }
   0x6   : > { %166 = sbr.rel (%p163_p2) target bundleno = 1100 (0x44c), region = 36  ;;  %277 = vmatprep.mubr.f32.mxu1 (!%p163_p2), %v712_v0  ;;  %671 = vmatprep.mubr.msk.f32.mxu0 (!%p163_p2), %vm713_vm0, %v712_v0  ;;  %vm202_vm2 = vcmask (!%p163_p2), 31744   ;;  %vm354_vm3 = vcmask (!%p163_p2), 1041408   ;;  %vm358_vm4 = vcmask (!%p163_p2), 844800   ;;  %v396_v35 = vld [vmem:[%s808_s1] sm:$0x7] (!%p163_p2) }
   0x7   : > { %v399_v31 = vshrl.u32 (!%p163_p2), %v398_v30, 7  ;;  %vm416_vm7 = vcmask (!%p163_p2), 582656   ;;  %s714_s25 = smov (!%p163_p2), 29   ;;  %s715_s26 = smov (!%p163_p2), 38   ;;  %v719_v54 = vmov (!%p163_p2), 0.0|0.0   ;;  %vm424_vm9 = vcmask (!%p163_p2), 310272  }
   0x8   : > { %s716_s27 = smov (!%p163_p2), 118   ;;  %s717_s28 = smov (!%p163_p2), 127   ;;  %674 = vmatprep.subr.bf16.mxu0 (!%p163_p2), %v719_v54  ;;  %vm453_vm10 = vcmask (!%p163_p2), 236544   ;;  %vm465_vm11 = vcmask (!%p163_p2), 146432  }
   0x9   : > { %v400_v32 = vsub.s32 (!%p163_p2), 0, %v399_v31  ;;  %v404_v40 = vsub.s32 (!%p163_p2), 1, %v399_v31  ;;  %v408_v50 = vsub.s32 (!%p163_p2), 2, %v399_v31  ;;  %s718_s29 = smov (!%p163_p2), 76   ;;  %s720_s30 = smov (!%p163_p2), 114  }
   0xa   : > { %s721_s5 = smov (!%p163_p2), 75   ;;  %s722_s6 = smov (!%p163_p2), 119  }
   0xb   : > { %v401_v39 = vrot.slane (!%p163_p2), %v396_v35, %v400_v32  ;;  %v405_v45 = vrot.slane (!%p163_p2), %v396_v35, %v404_v40  ;;  %v409_v52 = vrot.slane (!%p163_p2), %v396_v35, %v408_v50 }
   0xd   : > { %s813_s16 = smov (!%p187_p3, %s637_s16), 1 }
   0xe   : > { %s677_s17 = smul.u32 12, %s813_s16  ;;  %s643_s9 = sshll.u32 %s813_s16, 3 }
   0xf   : > { %s195_s12 = scalar_lea.vmem %s811_s4, %s643_s9 }
  0x10   : > { %s191_s20 = scalar_lea.vmem %s807_s0, %s677_s17 }
  0x11   : > { %v197_v1 = vld [vmem:[%s191_s20] sm:$0xff]  ;;  %v198_v4 = vld [vmem:[%s191_s20 + $0x8] sm:$0xf] }
  0x12   : > { %v201_v2 = vcombine.high %v197_v1, %v197_v1 }
  0x14   : > { %644 = vmatprep.subr.msk.mxu1 %vm206_vm1, %v201_v2 }
  0x15   : > { %645 = vmatpush1.msk.msra.mxu1 %vm206_vm1, %v197_v1 }
  0x16   : > { %646 = vmatmul.mubr.msk.f32.vlgmr.msra.gmra.mrb[0].mxu1 %vm202_vm2, %v196_v3  ;;  %660 = vmatprep.subr.mxu1 %v712_v0 }
  0x17   : > { %661 = vmatpush3.msk.msra.mxu1 %vm206_vm1, %v198_v4  ;;  %662 = vmatprep.mubr.msk.f32.mxu1 %vm713_vm0, %v712_v0  ;;  %vm564_vm0 = vcmask 588800  }
  0x1a   : > { %663 = vmatmul.mubr.msk.f32.vlgmr.msra.gmra.mrb[2].mxu1 %vm202_vm2, %v196_v3 }
  0xe9   : > { %v279_v5 = vpop.f32.mrb[0].mxu1 }
  0xea   : > { %v365_v6 = vmul.f32 %v279_v5, %v279_v5  ;;  %v281_v7 = vpop.f32.mrb[1].mxu1  ;;  %v355_v8 = vsel %vm354_vm3, %v279_v5, 0.0 }
  0xeb   : > { %v366_v9 = vmul.f32 %v281_v7, %v281_v7  ;;  %v356_v10 = vsel %vm354_vm3, %v281_v7, 0.0 }
  0xec   : > { %v357_v11 = vadd.f32 %v356_v10, %v355_v8  ;;  %v368_v12 = vsel %vm354_vm3, %v365_v6, 0.0  ;;  %v461_v8 = vld [vmem:[%s810_s3] sm:$0xff]  ;;  %v543_v10 = vand.u32 127, %v398_v30 }
  0xed   : > { %v350_v13 = vpop.f32.mrb[2].mxu1  ;;  %v369_v14 = vsel %vm354_vm3, %v366_v9, 0.0 }
  0xee   : > { %v367_v15 = vmul.f32 %v350_v13, %v350_v13  ;;  %v664_v16 = vpop.f32.mrb[3].mxu1  ;;  %v359_v17 = vsel %vm358_vm4, %v350_v13, 0.0  ;;  %v370_v18 = vadd.f32 %v369_v14, %v368_v12 }
  0xef   : > { %v360_v19 = vadd.f32 %v359_v17, %v357_v11  ;;  %v792_v11 = vmul.u32.u64.low 3817748708, %v543_v10  ;;  %v793_v12 = vmul.u32.u64.high 3817748708, %v543_v10, %v792_v11 }
  0xf0   : > { %v371_v20 = vsel %vm358_vm4, %v367_v15, 0.0 }
  0xf1   : > { %361 = vadd.xlane.f32.xlu0 %v360_v19  ;;  %v372_v21 = vadd.f32 %v371_v20, %v370_v18 }
  0xf5   : > { %373 = vadd.xlane.f32.xlu0 %v372_v21 }
 0x17e   : > { %v362_v22 = vpop.xlane.xlu0 %361 }
 0x17f   : > { %v364_v23 = vmul.f32 0.00390625, %v362_v22 }
 0x181   : > { %v376_v25 = vmul.f32 %v364_v23, %v364_v23  ;;  %v379_v33 = vsub.f32 %v279_v5, %v364_v23  ;;  %v380_v34 = vsub.f32 %v281_v7, %v364_v23  ;;  %v381_v48 = vsub.f32 %v350_v13, %v364_v23 }
 0x182   : > { %v374_v24 = vpop.xlane.xlu0 %373  ;;  %v550_v13 = vshrl.u32 %v793_v12, 3 }
 0x183   : > { %v375_v26 = vmul.f32 0.00390625, %v374_v24 }
 0x184   : > { %v551_v14 = vmul.u32 9, %v550_v13 }
 0x185   : > { %v377_v27 = vsub.f32 %v375_v26, %v376_v25 }
 0x186   : > { %v552_v15 = vsub.s32 %v543_v10, %v551_v14 }
 0x187   : > { %v378_v28 = vmax.f32 %v377_v27, 0.0 }
 0x188   : > { %vm555_vm12 = vcmp.ne.s32.totalorder %v552_v15, 0  ;;  %vm556_vm13 = vcmp.lt.s32.totalorder %v552_v15, 0  ;;  %v558_v16 = vadd.s32 9, %v552_v15 }
 0x189   : > { %v382_v29 = vadd.f32 1e-05, %v378_v28  ;;  %vm557_vm14 = vmand %vm556_vm13, %vm555_vm12 }
 0x18a   : > { %v559_v17 = vsel %vm557_vm14, %v558_v16, %v552_v15 }
 0x18b   : > { %700 = vrsqrt.f32 %v382_v29  ;;  %vm560_vm15 = vcmp.lt.s32.totalorder %v559_v17, 8 }
 0x18c   : > { %v651_v18 = vsel %vm560_vm15, 1.0, %v712_v0 }
 0x195   : > { %v701_v36 = vpop.eup %700 }
 0x196   : > { %v384_v37 = vmul.f32 %v701_v36, %v379_v33  ;;  %v385_v38 = vmul.f32 %v701_v36, %v380_v34  ;;  %v386_v49 = vmul.f32 %v701_v36, %v381_v48 }
 0x198   : > { %vm387_vm5 = vcmp.ge.f32.partialorder %v384_v37, 0.0  ;;  %v390_v41 = vmul.f32 0.01, %v384_v37  ;;  %v391_v42 = vmul.f32 0.01, %v385_v38  ;;  %vm388_vm6 = vcmp.ge.f32.partialorder %v385_v38, 0.0 }
 0x199   : > { %v392_v51 = vmul.f32 0.01, %v386_v49  ;;  %vm389_vm8 = vcmp.ge.f32.partialorder %v386_v49, 0.0 }
 0x19a   : > { %v393_v43 = vsel %vm387_vm5, %v384_v37, %v390_v41  ;;  %v394_v46 = vsel %vm388_vm6, %v385_v38, %v391_v42 }
 0x19b   : > { %v413_v44 = vmul.f32 %v401_v39, %v393_v43  ;;  %v414_v47 = vmul.f32 %v405_v45, %v394_v46  ;;  %v395_v53 = vsel %vm389_vm8, %v386_v49, %v392_v51 }
 0x19c   : > { %v415_v55 = vmul.f32 %v409_v52, %v395_v53 }
 0x19d   : > { %449 = vrot.lane.b32.xlu0 %v413_v44, %s714_s25  ;;  %420 = vrot.lane.b32.xlu1 %v413_v44, %s715_s26  ;;  %417 = vst.msk [vmem:[#allocation2] sm:$0x3] %vm416_vm7, %v413_v44 }
 0x1a1   : > { %457 = vrot.lane.b32.xlu0 %v413_v44, %s716_s27  ;;  %422 = vrot.lane.b32.xlu1 %v414_v47, %s715_s26 }
 0x1a5   : > { %451 = vrot.lane.b32.xlu1 %v414_v47, %s714_s25 }
 0x1a9   : > { %428 = vrot.lane.b32.xlu1 %v413_v44, %s717_s28 }
 0x1ad   : > { %432 = vrot.lane.b32.xlu1 %v414_v47, %s718_s29 }
 0x1b1   : > { %437 = vrot.lane.b32.xlu1 %v415_v55, %s720_s30 }
 0x1b5   : > { %441 = vrot.lane.b32.xlu1 %v414_v47, %s721_s5 }
 0x1b9   : > { %445 = vrot.lane.b32.xlu1 %v413_v44, %s722_s6 }
 0x20f   : > { %v450_v56 = vpop.permute.xlu0 %449  ;;  %v421_v57 = vpop.permute.xlu1 %420 }
 0x213   : > { %v458_v58 = vpop.permute.xlu0 %457  ;;  %v423_v59 = vpop.permute.xlu1 %422 }
 0x214   : > { %460 = vst.msk [vmem:[#allocation2 + $0x10] sm:$0x3] %vm416_vm7, %v458_v58  ;;  %v425_v60 = vsel %vm424_vm9, %v421_v57, %v423_v59 }
 0x215   : > { %427 = vst.msk [vmem:[#allocation2 + $0x2] sm:$0x3] %vm416_vm7, %v425_v60 }
 0x217   : > { %v452_v61 = vpop.permute.xlu1 %451 }
 0x218   : > { %v454_v62 = vsel %vm453_vm10, %v450_v56, %v452_v61 }
 0x219   : > { %456 = vst.msk [vmem:[#allocation2 + $0xe] sm:$0x3] %vm416_vm7, %v454_v62 }
 0x21b   : > { %v429_v63 = vpop.permute.xlu1 %428  ;;  %v464_v9 = vld [vmem:[#allocation2 + $0x10] sm:$0x3] }
 0x21c   : > { %431 = vst.msk [vmem:[#allocation2 + $0x4] sm:$0x3] %vm416_vm7, %v429_v63 }
 0x21f   : > { %v433_v1 = vpop.permute.xlu1 %432 }
 0x220   : > { %435 = vst.msk [vmem:[#allocation2 + $0x6] sm:$0x3] %vm416_vm7, %v433_v1 }
 0x223   : > { %v438_v2 = vpop.permute.xlu1 %437 }
 0x224   : > { %440 = vst.msk [vmem:[#allocation2 + $0x8] sm:$0x3] %vm416_vm7, %v438_v2 }
 0x227   : > { %v442_v3 = vpop.permute.xlu1 %441  ;;  %v462_v5 = vld [vmem:[#allocation2] sm:$0xff] }
 0x228   : > { %444 = vst.msk [vmem:[#allocation2 + $0xa] sm:$0x3] %vm416_vm7, %v442_v3 }
 0x22b   : > { %v446_v4 = vpop.permute.xlu1 %445 }
 0x22c   : > { %448 = vst.msk [vmem:[#allocation2 + $0xc] sm:$0x3] %vm416_vm7, %v446_v4 }
 0x233   : > { %v463_v6 = vld [vmem:[#allocation2 + $0x8] sm:$0xff] }
 0x234   : > { %v675_v7 = vpack.c.bf16 %v463_v6, %v462_v5 }
 0x236   : > { %676 = vmatpush3.bf16.msra.mxu0 %v675_v7 }
 0x237   : > { %669 = vmatprep.subr.mxu0 %v712_v0 }
 0x23a   : > { %670 = vmatpush3.msk.msra.mxu0 %vm354_vm3, %v464_v9 }
 0x23b   : > { %672 = vmatmul.mubr.msk.f32.vlgmr.msra.gmra.mrb[0].mxu0 %vm465_vm11, %v461_v8 }
 0x30e   : > { %v538_v19 = vpop.f32.mrb[0].mxu0 }
 0x30f   : > { %v563_v20 = vmul.f32 %v651_v18, %v538_v19  ;;  %v673_v21 = vpop.f32.mrb[1].mxu0 }
 0x311   : > { %v565_v22 = vsel %vm564_vm0, %v563_v20, 0.0 }
 0x312   : > { %566 = vadd.xlane.f32.xlu1 %v565_v22 }
 0x39f   : > { %v567_v23 = vpop.xlane.xlu1 %566 }
 0x3a0   : > { %v569_v24 = vmul.f32 0.015625, %v567_v23 }
 0x3a2   : > { %v570_v25 = vsub.f32 %v538_v19, %v569_v24 }
 0x3a4   : > { %v571_v26 = vmul.f32 %v570_v25, %v570_v25 }
 0x3a6   : > { %v572_v27 = vmul.f32 %v651_v18, %v571_v26 }
 0x3a8   : > { %v573_v28 = vsel %vm564_vm0, %v572_v27, 0.0 }
 0x3a9   : > { %574 = vadd.xlane.f32.xlu0 %v573_v28 }
 0x436   : > { %v575_v29 = vpop.xlane.xlu0 %574 }
 0x437   : > { %v576_v30 = vmul.f32 0.015625, %v575_v29 }
 0x439   : > { %v577_v31 = vadd.f32 1e-05, %v576_v30 }
 0x43b   : > { %702 = vrsqrt.f32 %v577_v31 }
 0x445   : > { %v703_v0 = vpop.eup %702 }
 0x446   : > { %v579_v32 = vmul.f32 %v703_v0, %v570_v25 }
 0x448   : > { %vm580_vm1 = vcmp.ge.f32.partialorder %v579_v32, 0.0  ;;  %v581_v33 = vmul.f32 0.01, %v579_v32 }
 0x44a   : > { %v582_v34 = vsel %vm580_vm1, %v579_v32, %v581_v33 }
 0x44b   : > { %583 = vst.msk [vmem:[%s195_s12] sm:$0xff] %vm564_vm0, %v582_v34 }
 0x44c PF: > { %s14_s15 = sadd.s32 1, %s710_s15  }
 0x44d   : > { %p11_p4 = scmp.ge.s32.totalorder %s14_s15, 4  }
 0x44f   :  { %13 = sbr.rel (!%p11_p4) target bundleno = 1 (0x1), region = 66 }

// kernel: auxiliary_forward.3
= control target key start
LH: loop header
LB: loop body
LE: loop exit
PB: predicated region body
PF: predicated region fallthrough
CT: control target
= control target key end

     0   :  { %s665_s15 = smov 0   ;;  %s722_s0 = inlined_call_operand.vmem [shape: f32[2,8,120], index: 0, kind: input, shape index: {}]   ;;  %s723_s1 = inlined_call_operand.vmem [shape: f32[1,120], index: 1, kind: input, shape index: {}]   ;;  %s724_s2 = inlined_call_operand.vmem [shape: f32[4,8], index: 2, kind: input, shape index: {}]   ;;  %s725_s3 = inlined_call_operand.vmem [shape: f32[16,36], index: 3, kind: input, shape index: {}]   ;;  %s726_s4 = inlined_call_operand.vmem [shape: f32[2,16,20], index: 4, kind: output, shape index: {}]  }
   0x1 LB: > { %s544_s16 = sadd.s32 4294967295, %s628_s15   ;;  %p548_p0 = scmp.ge.s32.totalorder %s628_s15, 1  ;;  %s628_s15 = sphi %s665_s15, %s14_s15  }
   0x2   : > { %p161_p1 = scmp.lt.s32.totalorder %s628_s15, 3 }
   0x4   : > { %p162_p2 = pnand %p548_p0, %p161_p1 }
   0x5   : > { %p186_p3 = scmp.lt.s32.totalorder (!%p162_p2), %s544_s16, 1  ;;  %v630_v0 = vmov (!%p162_p2), 0.0   ;;  %vm631_vm0 = vmmov (!%p162_p2), 0   ;;  %v195_v1 = vld [vmem:[%s724_s2] sm:$0xf] (!%p162_p2)  ;;  %vm197_vm1 = vcmask (!%p162_p2), 64512   ;;  %v428_v40 = vlaneseq (!%p162_p2) }
   0x6   : > { %165 = sbr.rel (%p162_p2) target bundleno = 1084 (0x43c), region = 36  ;;  %570 = vmatprep.subr.mxu0 (!%p162_p2), %v630_v0  ;;  %572 = vmatprep.mubr.msk.f32.mxu0 (!%p162_p2), %vm631_vm0, %v630_v0  ;;  %vm271_vm2 = vcmask (!%p162_p2), 977920   ;;  %v553_v19 = vld [vmem:[%s723_s1] ss:$0 sm:$0xff] (!%p162_p2)  ;;  %vm300_vm4 = vcmask (!%p162_p2), 158720   ;;  %s632_s25 = smov (!%p162_p2), 68  }
   0x7   : > { %s633_s26 = smov (!%p162_p2), 98   ;;  %s634_s27 = smov (!%p162_p2), 127   ;;  %v335_v23 = vld [vmem:[%s725_s3] sm:$0xff] (!%p162_p2)  ;;  %vm342_vm5 = vcmask (!%p162_p2), 293888   ;;  %vm349_vm6 = vcmask (!%p162_p2), 1043456   ;;  %v336_v39 = vld [vmem:[%s725_s3 + $0x8] sm:$0xff] (!%p162_p2) }
   0x8   : > { %s635_s28 = smov (!%p162_p2), 38   ;;  %s636_s29 = smov (!%p162_p2), 67   ;;  %585 = vmatprep.mubr.msk.f32.mxu1 (!%p162_p2), %vm342_vm5, %v335_v23  ;;  %v429_v41 = vand.u32 (!%p162_p2), 127, %v428_v40  ;;  %vm451_vm11 = vcmask (!%p162_p2), 162816  }
   0x9   : > { %s637_s30 = smov (!%p162_p2), 123   ;;  %s638_s5 = smov (!%p162_p2), 93  }
   0xa   : > { %s639_s8 = smov (!%p162_p2), 122   ;;  %v704_v42 = vmul.u32.u64.low (!%p162_p2), 3435973837, %v429_v41  ;;  %v705_v43 = vmul.u32.u64.high 3435973837, %v429_v41, %v704_v42 }
   0xc   : > { %v436_v44 = vshrl.u32 (!%p162_p2), %v705_v43, 2 }
   0xd   : > { %s728_s16 = smov (!%p186_p3, %s544_s16), 1 }
   0xe   : > { %s549_s17 = sshll.u32 %s728_s16, 3  ;;  %v437_v45 = vmul.u32 5, %v436_v44  ;;  %s560_s11 = sshll.u32 %s728_s16, 4 }
   0xf   : > { %s189_s20 = scalar_lea.vmem %s722_s0, %s549_s17  ;;  %s194_s14 = scalar_lea.vmem %s726_s4, %s560_s11 }
  0x10   : > { %v196_v2 = vld [vmem:[%s189_s20] sm:$0xff]  ;;  %v438_v46 = vsub.s32 %v429_v41, %v437_v45 }
  0x11   : > { %571 = vmatpush3.msra.mxu0 %v196_v2 }
  0x12   : > { %573 = vmatmul.mubr.msk.f32.vlgmr.msra.gmra.mrb[0].mxu0 %vm197_vm1, %v195_v1  ;;  %vm441_vm7 = vcmp.ne.s32.totalorder %v438_v46, 0  ;;  %vm442_vm8 = vcmp.lt.s32.totalorder %v438_v46, 0  ;;  %v444_v47 = vadd.s32 5, %v438_v46 }
  0x13   : > { %vm443_vm9 = vmand %vm442_vm8, %vm441_vm7 }
  0x14   : > { %v445_v48 = vsel %vm443_vm9, %v444_v47, %v438_v46 }
  0x15   : > { %vm446_vm10 = vcmp.lt.s32.totalorder %v445_v48, 4 }
  0x16   : > { %v557_v49 = vsel %vm446_vm10, 1.0, %v630_v0 }
  0xe5   : > { %v267_v3 = vpop.f32.mrb[0].mxu0 }
  0xe6   : > { %v574_v4 = vpop.f32.mrb[1].mxu0  ;;  %v272_v5 = vsel %vm271_vm2, %v267_v3, 0.0  ;;  %v277_v6 = vmul.f32 %v267_v3, %v267_v3 }
  0xe7   : > { %273 = vadd.xlane.f32.xlu0 %v272_v5 }
  0xe8   : > { %v278_v7 = vsel %vm271_vm2, %v277_v6, 0.0 }
  0xeb   : > { %279 = vadd.xlane.f32.xlu0 %v278_v7 }
 0x174   : > { %v274_v8 = vpop.xlane.xlu0 %273 }
 0x175   : > { %v276_v9 = vmul.f32 0.015625, %v274_v8 }
 0x177   : > { %v282_v11 = vmul.f32 %v276_v9, %v276_v9  ;;  %v285_v16 = vsub.f32 %v267_v3, %v276_v9 }
 0x178   : > { %v280_v10 = vpop.xlane.xlu0 %279 }
 0x179   : > { %v281_v12 = vmul.f32 0.015625, %v280_v10 }
 0x17b   : > { %v283_v13 = vsub.f32 %v281_v12, %v282_v11 }
 0x17d   : > { %v284_v14 = vmax.f32 %v283_v13, 0.0 }
 0x17f   : > { %v286_v15 = vadd.f32 1e-05, %v284_v14 }
 0x181   : > { %616 = vrsqrt.f32 %v286_v15 }
 0x18b   : > { %v617_v17 = vpop.eup %616 }
 0x18c   : > { %v288_v18 = vmul.f32 %v617_v17, %v285_v16 }
 0x18e   : > { %vm289_vm3 = vcmp.ge.f32.partialorder %v288_v18, 0.0  ;;  %v290_v20 = vmul.f32 0.01, %v288_v18 }
 0x190   : > { %v291_v21 = vsel %vm289_vm3, %v288_v18, %v290_v20 }
 0x191   : > { %v299_v22 = vmul.f32 %v553_v19, %v291_v21 }
 0x193   : > { %311 = vrot.lane.b32.xlu0 %v299_v22, %s632_s25  ;;  %303 = vrot.lane.b32.xlu1 %v299_v22, %s633_s26  ;;  %301 = vst.msk [vmem:[#allocation2] sm:$0xf] %vm300_vm4, %v299_v22 }
 0x197   : > { %307 = vrot.lane.b32.xlu1 %v299_v22, %s634_s27 }
 0x19b   : > { %315 = vrot.lane.b32.xlu1 %v299_v22, %s635_s28 }
 0x19f   : > { %319 = vrot.lane.b32.xlu1 %v299_v22, %s636_s29 }
 0x1a3   : > { %323 = vrot.lane.b32.xlu1 %v299_v22, %s637_s30 }
 0x1a7   : > { %327 = vrot.lane.b32.xlu1 %v299_v22, %s638_s5 }
 0x1ab   : > { %331 = vrot.lane.b32.xlu1 %v299_v22, %s639_s8 }
 0x205   : > { %v312_v24 = vpop.permute.xlu0 %311  ;;  %v304_v25 = vpop.permute.xlu1 %303 }
 0x206   : > { %314 = vst.msk [vmem:[#allocation2 + $0xc] sm:$0xf] %vm300_vm4, %v312_v24  ;;  %306 = vst.msk [vmem:[#allocation2 + $0x4] sm:$0xf] %vm300_vm4, %v304_v25 }
 0x209   : > { %v308_v26 = vpop.permute.xlu1 %307 }
 0x20a   : > { %310 = vst.msk [vmem:[#allocation2 + $0x8] sm:$0xf] %vm300_vm4, %v308_v26 }
 0x20d   : > { %v316_v27 = vpop.permute.xlu1 %315  ;;  %v337_v29 = vld [vmem:[#allocation2] sm:$0xff] }
 0x20e   : > { %318 = vst.msk [vmem:[#allocation2 + $0x10] sm:$0xf] %vm300_vm4, %v316_v27 }
 0x211   : > { %v320_v28 = vpop.permute.xlu1 %319  ;;  %v338_v30 = vld [vmem:[#allocation2 + $0x8] sm:$0xff] }
 0x212   : > { %322 = vst.msk [vmem:[#allocation2 + $0x14] sm:$0xf] %vm300_vm4, %v320_v28  ;;  %v588_v31 = vpack.c.bf16 %v338_v30, %v337_v29 }
 0x214   : > { %589 = vmatprep.subr.bf16.mxu1 %v588_v31 }
 0x215   : > { %v324_v32 = vpop.permute.xlu1 %323  ;;  %591 = vmatpush3.bf16.msra.mxu1 %v588_v31 }
 0x216   : > { %326 = vst.msk [vmem:[#allocation2 + $0x18] sm:$0xf] %vm300_vm4, %v324_v32 }
 0x219   : > { %v328_v33 = vpop.permute.xlu1 %327  ;;  %v339_v35 = vld [vmem:[#allocation2 + $0x10] sm:$0xff] }
 0x21a   : > { %330 = vst.msk [vmem:[#allocation2 + $0x1c] sm:$0xf] %vm300_vm4, %v328_v33 }
 0x21d   : > { %v332_v34 = vpop.permute.xlu1 %331 }
 0x21e   : > { %334 = vst.msk [vmem:[#allocation2 + $0x20] sm:$0xf] %vm300_vm4, %v332_v34 }
 0x221   : > { %v340_v36 = vld [vmem:[#allocation2 + $0x18] sm:$0xff] }
 0x222   : > { %v592_v37 = vpack.c.bf16 %v340_v36, %v339_v35 }
 0x224   : > { %593 = vmatprep.subr.bf16.mxu1 %v592_v37 }
 0x225   : > { %595 = vmatpush3.bf16.msra.mxu1 %v592_v37  ;;  %v341_v38 = vld [vmem:[#allocation2 + $0x20] sm:$0xf] }
 0x226   : > { %583 = vmatprep.subr.msk.mxu1 %vm349_vm6, %v341_v38 }
 0x229   : > { %584 = vmatpush3.msk.msra.mxu1 %vm349_vm6, %v341_v38 }
 0x22a   : > { %586 = vmatmul.mubr.msk.f32.vlgmr.msra.gmra.mrb[0].mxu1 %vm342_vm5, %v336_v39 }
 0x2fd   : > { %v587_v50 = vpop.f32.mrb[0].mxu1 }
 0x2fe   : > { %v450_v51 = vmul.f32 %v587_v50, %v557_v49  ;;  %v419_v52 = vpop.f32.mrb[1].mxu1 }
 0x2ff   : > { %v449_v53 = vmul.f32 %v557_v49, %v419_v52 }
 0x300   : > { %v455_v54 = vsel %vm451_vm11, %v450_v51, 0.0 }
 0x301   : > { %456 = vadd.xlane.f32.xlu0 %v455_v54  ;;  %v452_v55 = vsel %vm451_vm11, %v449_v53, 0.0 }
 0x302   : > { %453 = vadd.xlane.f32.xlu1 %v452_v55 }
 0x38e   : > { %v457_v56 = vpop.xlane.xlu0 %456 }
 0x38f   : > { %v460_v57 = vmul.f32 0.0625, %v457_v56  ;;  %v454_v58 = vpop.xlane.xlu1 %453 }
 0x390   : > { %v459_v59 = vmul.f32 0.0625, %v454_v58 }
 0x391   : > { %v462_v60 = vsub.f32 %v587_v50, %v460_v57 }
 0x392   : > { %v461_v61 = vsub.f32 %v419_v52, %v459_v59 }
 0x393   : > { %v464_v62 = vmul.f32 %v462_v60, %v462_v60 }
 0x394   : > { %v463_v63 = vmul.f32 %v461_v61, %v461_v61 }
 0x395   : > { %v466_v0 = vmul.f32 %v557_v49, %v464_v62 }
 0x396   : > { %v465_v1 = vmul.f32 %v557_v49, %v463_v63 }
 0x397   : > { %v470_v2 = vsel %vm451_vm11, %v466_v0, 0.0 }
 0x398   : > { %471 = vadd.xlane.f32.xlu1 %v470_v2  ;;  %v467_v3 = vsel %vm451_vm11, %v465_v1, 0.0 }
 0x399   : > { %468 = vadd.xlane.f32.xlu0 %v467_v3 }
 0x425   : > { %v472_v4 = vpop.xlane.xlu1 %471 }
 0x426   : > { %v474_v5 = vmul.f32 0.0625, %v472_v4  ;;  %v469_v6 = vpop.xlane.xlu0 %468 }
 0x427   : > { %v473_v7 = vmul.f32 0.0625, %v469_v6 }
 0x428   : > { %v476_v8 = vadd.f32 1e-05, %v474_v5 }
 0x429   : > { %v475_v9 = vadd.f32 1e-05, %v473_v7 }
 0x42a   : > { %618 = vrsqrt.f32 %v476_v8 }
 0x42b   : > { %620 = vrsqrt.f32 %v475_v9 }
 0x434   : > { %v619_v10 = vpop.eup %618 }
 0x435   : > { %v621_v11 = vpop.eup %620  ;;  %v480_v12 = vmul.f32 %v619_v10, %v462_v60 }
 0x436   : > { %v479_v13 = vmul.f32 %v621_v11, %v461_v61 }
 0x437   : > { %vm482_vm12 = vcmp.ge.f32.partialorder %v480_v12, 0.0  ;;  %v484_v14 = vmul.f32 0.01, %v480_v12 }
 0x438   : > { %vm481_vm13 = vcmp.ge.f32.partialorder %v479_v13, 0.0  ;;  %v483_v15 = vmul.f32 0.01, %v479_v13 }
 0x439   : > { %v486_v16 = vsel %vm482_vm12, %v480_v12, %v484_v14 }
 0x43a   : > { %488 = vst.msk [vmem:[%s194_s14 + $0x8] sm:$0xff] %vm451_vm11, %v486_v16  ;;  %v485_v17 = vsel %vm481_vm13, %v479_v13, %v483_v15 }
 0x43b   : > { %487 = vst.msk [vmem:[%s194_s14] sm:$0xff] %vm451_vm11, %v485_v17 }
 0x43c PF: > { %s14_s15 = sadd.s32 1, %s628_s15  }
 0x43d   : > { %p11_p4 = scmp.ge.s32.totalorder %s14_s15, 4  }
 0x43f   :  { %13 = sbr.rel (!%p11_p4) target bundleno = 1 (0x1), region = 66 }

</bundles_post_ra>
